<compile_context>
chip_gen: v6e
topology: v6e:2x2x1
jax: 0.10.0
libtpu: 0.0.40
codegen_flags: <defaults>
</compile_context>

<pallas_src>
import functools

import jax
import jax.numpy as jnp
from jax.experimental import pallas as pl
from jax.experimental.pallas import tpu as pltpu

# ----------------------------------------------------------------------------
# Model configuration (small, deterministic, consistent with the module).
# ----------------------------------------------------------------------------
B = 8
HIDDEN_SIZE = 32
CONST_LATENT_DIM = 32
SPEC = {"out_dim": 3, "groups": 4, "quantize_num": 16}

LEAKY_SLOPE = 0.2      # nn.LeakyReLU(0.2, False)
BN_EPS = 1e-5
LANE = 128             # lane-dense padding for the output head / slabs
SUBLANE_BF16 = 16      # bf16 sublane-pack quantum: weight-slab row alignment


def _leaky(x):
    return jnp.where(x >= 0, x, LEAKY_SLOPE * x)


def const_block_config(hidden_size, groups, out_dim):
    """Reproduce the while-loop in AttentionEncoderFromSpec.__init__."""
    hc = int(hidden_size / groups)
    blocks = []
    idx = 0
    while True:
        size_out = int(hc / 2 ** (idx + 1))
        if size_out <= out_dim:
            break
        size_in = int(hc / 2 ** idx)
        blocks.append((size_in, min(size_in, size_out), size_out))  # (in, hidden, out)
        idx += 1
    final_in = int(hc / 2 ** idx)
    return hc, blocks, final_in


# ----------------------------------------------------------------------------
# Fused kernel: AttentionConstMemory -> GroupWiseResnetBlockConv1d
#               -> LeakyReLU (x2, per the reference forward) -> grouped fc_out.
# All weights arrive as ONE bf16 slab, all biases/affines as ONE f32 slab.
# ----------------------------------------------------------------------------
def _attention_encoder_kernel(d, x_ref, w_ref, v_ref, out_ref):
    L, GK = d["L"], d["GK"]
    GSin, GSh, GSout, NBIG = d["GSin"], d["GSh"], d["GSout"], d["NBIG"]
    F_in = d["F_in"]

    x = x_ref[...]                                                     # [B, L] f32

    # Static views into the packed bf16 weight slab (zero-cost slices).
    wqk = w_ref[d["r_wqk"]:d["r_wqk"] + L, :GK]
    wbig = w_ref[d["r_wbig"]:d["r_wbig"] + GK, :2 * NBIG]
    w0 = w_ref[d["r_w0"]:d["r_w0"] + GSin, :GSh]
    w1 = w_ref[d["r_w1"]:d["r_w1"] + GSh, :GSout]
    wout = w_ref[d["r_wout"]:d["r_wout"] + F_in, :]

    # Per-channel affines / biases (f32 rows of the vector slab).
    bqk = v_ref[0:1, :GK]
    h0 = v_ref[1:2, :GSin]
    s1 = v_ref[2:3, :GSh]
    h1p = v_ref[3:4, :GSh]
    b1 = v_ref[4:5, :GSout]
    bout = v_ref[5:6, :]

    # --- Layer 0: AttentionConstMemory (query projection folded into keys).
    # TODO(synk): layers.AttentionConstMemory source not provided; canonical
    # scaled-dot-product attention over a per-group learnable constant memory.
    logits = jnp.dot(x.astype(jnp.bfloat16), wqk,
                     preferred_element_type=jnp.float32) + bqk          # [B, G*K]
    m = jnp.max(logits, axis=-1, keepdims=True)   # row-global max: softmax-shift-invariant per group
    e = jnp.exp(logits - m)
    # One matmul from e yields both (h*s0, h@ws) numerators and their per-group
    # softmax denominators (bn0 scale + residual shortcut folded into values).
    res = jnp.dot(e.astype(jnp.bfloat16), wbig,
                  preferred_element_type=jnp.float32)                   # [B, 2*NBIG]
    num = res[:, :NBIG]
    den = jnp.maximum(res[:, NBIG:2 * NBIG], 1e-30)   # guard cold-group exp underflow
    comb = num * pl.reciprocal(den, approx=True)
    hs0 = comb[:, :GSin]            # = bn0_scale * attention output
    xs = comb[:, GSin:NBIG]         # = shortcut(attention output)   (bias-free)

    # --- GroupWiseResnetBlockConv1d (eval BN folded; conv0 bias folded into bn1).
    # TODO(synk): GroupWiseResnetBlockConv1d source not provided; canonical
    # occupancy-net residual 1x1-conv block (ReLU actvn, bias-free conv shortcut).
    net = jnp.maximum(hs0 + h0, 0.0)
    net = jnp.dot(net.astype(jnp.bfloat16), w0, preferred_element_type=jnp.float32)
    dx = jnp.maximum(net * s1 + h1p, 0.0)
    dx = jnp.dot(dx.astype(jnp.bfloat16), w1, preferred_element_type=jnp.float32) + b1
    h = xs + dx

    # self.act appended to the layer list + self.act applied again in the
    # forward -> LeakyReLU(0.2) twice == single select with slope 0.04.
    ya = jnp.where(h >= 0, h, jnp.float32(LEAKY_SLOPE * LEAKY_SLOPE) * h)

    # Grouped fc_out, lane-dense padded to 128 -> one unmasked [B, 128] store.
    out_ref[...] = jnp.dot(ya.astype(jnp.bfloat16), wout,
                           preferred_element_type=jnp.float32) + bout


# ----------------------------------------------------------------------------
# Host-side parameter init and packing.
# ----------------------------------------------------------------------------
def _block_diag(blocks):
    """blocks: [G, ci, co] -> block-diagonal [G*ci, G*co]."""
    g, ci, co = blocks.shape
    out = jnp.zeros((g * ci, g * co), jnp.float32)
    for i in range(g):
        out = out.at[i * ci:(i + 1) * ci, i * co:(i + 1) * co].set(blocks[i])
    return out


def _align(n, m):
    return ((n + m - 1) // m) * m


def init_raw_params(key):
    G, K, Od = SPEC["groups"], SPEC["quantize_num"], SPEC["out_dim"]
    Hc, blocks, final_in = const_block_config(HIDDEN_SIZE, G, Od)
    keys = iter(jax.random.split(key, 128))

    def nrm(shape, s=0.1):
        return jax.random.normal(next(keys), shape, jnp.float32) * s

    raw = {
        # AttentionConstMemory: query projection (pre-transposed [in, out]) and
        # per-group constant memory [G, K, Hc].
        "wq": nrm((CONST_LATENT_DIM, G * Hc)),
        "bq": nrm((G * Hc,)),
        "memory": jax.random.normal(next(keys), (G, K, Hc), jnp.float32),
        "blocks": [],
        # grouped fc_out stored per-group as [G, in, out]
        "wout": nrm((G, final_in, Od)),
        "bout": nrm((G * Od,)),
        "_dims": (G, K, Hc, tuple(blocks), final_in, Od),
    }
    for (Sin, Sh, Sout) in blocks:
        raw["blocks"].append({
            "bn0_gamma": 1.0 + nrm((G * Sin,)), "bn0_beta": nrm((G * Sin,)),
            "bn0_mean": nrm((G * Sin,)), "bn0_var": 1.0 + jnp.abs(nrm((G * Sin,))),
            "w0": nrm((G, Sin, Sh)), "b0": nrm((G * Sh,)),
            "bn1_gamma": 1.0 + nrm((G * Sh,)), "bn1_beta": nrm((G * Sh,)),
            "bn1_mean": nrm((G * Sh,)), "bn1_var": 1.0 + jnp.abs(nrm((G * Sh,))),
            "w1": nrm((G, Sh, Sout)), "b1": nrm((G * Sout,)),
            "ws": nrm((G, Sin, Sout)),
        })
    return raw


def pack_params(raw):
    """Fold / block-diagonalize everything host-side into two packed slabs."""
    G, K, Hc, blocks, final_in, Od = raw["_dims"]
    # The value-side folds below (bn0 scale + shortcut into the attention value
    # matmul) are specific to the single-resnet-block config this spec yields.
    assert len(blocks) == 1, "packing specialized to the 1-block config this spec yields"
    Sin, Sh, Sout = blocks[0]
    p = raw["blocks"][0]

    # eval-mode BatchNorm -> per-channel affine
    s0 = p["bn0_gamma"] / jnp.sqrt(p["bn0_var"] + BN_EPS)
    h0 = p["bn0_beta"] - p["bn0_mean"] * s0
    s1 = p["bn1_gamma"] / jnp.sqrt(p["bn1_var"] + BN_EPS)
    h1 = p["bn1_beta"] - p["bn1_mean"] * s1
    h1p = h1 + p["b0"] * s1                    # fold conv0 bias into bn1 affine

    # block-diagonal packing of every grouped 1x1 conv / per-group memory
    memk_bd = _block_diag(jnp.transpose(raw["memory"], (0, 2, 1))
                          / jnp.sqrt(jnp.float32(Hc)))    # [G*Hc, G*K], 1/sqrt(Hc) folded
    memv_bd = _block_diag(raw["memory"])                  # [G*K, G*Hc]
    w0_bd = _block_diag(p["w0"])                          # [G*Sin, G*Sh]
    w1_bd = _block_diag(p["w1"])                          # [G*Sh, G*Sout]
    ws_bd = _block_diag(p["ws"])                          # [G*Sin, G*Sout]
    wout_bd = _block_diag(raw["wout"])                    # [G*final_in, G*Od]

    # fold the query projection into the keys: logits = x @ wqk + bqk
    wqk = raw["wq"] @ memk_bd                             # [latent, G*K]
    bqk = (raw["bq"][None, :] @ memk_bd)[0]               # [G*K]

    # value-side fold: one matmul from e yields the numerators of (h * s0) and
    # (h @ ws) plus their per-group softmax denominators (block-ones columns)
    GSin, GSh, GSout, GK, GOd, F_in = G * Sin, G * Sh, G * Sout, G * K, G * Od, G * final_in
    nbig = GSin + GSout
    wv_s0 = memv_bd * s0[None, :]                         # [G*K, G*Sin]
    wv_ws = memv_bd @ ws_bd                               # [G*K, G*Sout]
    seg = jnp.zeros((GK, nbig), jnp.float32)
    for g in range(G):
        seg = seg.at[g * K:(g + 1) * K, g * Sin:(g + 1) * Sin].set(1.0)
        seg = seg.at[g * K:(g + 1) * K, GSin + g * Sout:GSin + (g + 1) * Sout].set(1.0)
    wbig = jnp.concatenate([wv_s0, wv_ws, seg], axis=1)   # [G*K, 2*nbig]

    # ---- one bf16 weight slab: each matrix at a 16-row-aligned offset, 128 lanes
    mats = [("wqk", wqk), ("wbig", wbig), ("w0", w0_bd), ("w1", w1_bd), ("wout", wout_bd)]
    offs, rows = {}, 0
    for name, mtx in mats:
        offs[name] = rows
        rows = _align(rows + mtx.shape[0], SUBLANE_BF16)
    wslab = jnp.zeros((rows, LANE), jnp.float32)
    for name, mtx in mats:
        r = offs[name]
        wslab = wslab.at[r:r + mtx.shape[0], :mtx.shape[1]].set(mtx)
    wslab = wslab.astype(jnp.bfloat16)

    # ---- one f32 vector slab (biases / folded affines), one row each
    vslab = jnp.zeros((8, LANE), jnp.float32)
    vslab = vslab.at[0, :GK].set(bqk)
    vslab = vslab.at[1, :GSin].set(h0)
    vslab = vslab.at[2, :GSh].set(s1)
    vslab = vslab.at[3, :GSh].set(h1p)
    vslab = vslab.at[4, :GSout].set(p["b1"])
    vslab = vslab.at[5, :GOd].set(raw["bout"])

    dims = dict(L=CONST_LATENT_DIM, GK=GK, GSin=GSin, GSh=GSh, GSout=GSout,
                NBIG=nbig, F_in=F_in,
                r_wqk=offs["wqk"], r_wbig=offs["wbig"], r_w0=offs["w0"],
                r_w1=offs["w1"], r_wout=offs["wout"])
    return wslab, vslab, dims


# ----------------------------------------------------------------------------
# Forward wrapper (gridless; <100 KB working set; dispatch-bound workload).
# ----------------------------------------------------------------------------
def attention_encoder_forward(wslab, vslab, dims, x):
    G, Od = SPEC["groups"], SPEC["out_dim"]
    bsz = x.shape[0]
    vmem = pl.BlockSpec(memory_space=pltpu.MemorySpace.VMEM)
    kernel = functools.partial(_attention_encoder_kernel, dims)
    out = pl.pallas_call(
        kernel,
        out_shape=jax.ShapeDtypeStruct((bsz, LANE), jnp.float32),
        in_specs=[vmem, vmem, vmem],
        out_specs=vmem,
        compiler_params=pltpu.CompilerParams(vmem_limit_bytes=4 * 1024 * 1024),
        cost_estimate=pl.CostEstimate(flops=190_000, transcendentals=1_000,
                                      bytes_accessed=52_000),
    )(x, wslab, vslab)
    return out[:, :G * Od].reshape(bsz, G, Od)


# ----------------------------------------------------------------------------
# Plain-JAX reference mirroring the ORIGINAL (unfolded) module math, f32.
# Validates the host-side folds + bf16 + approx-reciprocal end to end.
# ----------------------------------------------------------------------------
def _grouped_mm(x, w):
    """x: [B, G*ci] channels-last; w: [G, ci, co] -> [B, G*co]."""
    bsz = x.shape[0]
    g, ci, co = w.shape
    return jnp.einsum("bgi,gio->bgo", x.reshape(bsz, g, ci), w,
                      precision=jax.lax.Precision.HIGHEST).reshape(bsz, g * co)


def reference_forward(raw, x):
    G, K, Hc, blocks, final_in, Od = raw["_dims"]
    hp = jax.lax.Precision.HIGHEST
    bsz = x.shape[0]

    # AttentionConstMemory (assumed canonical scaled-dot-product over memory)
    q = (jnp.dot(x, raw["wq"], precision=hp) + raw["bq"]).reshape(bsz, G, Hc)
    mem = raw["memory"]                                    # [G, K, Hc]
    logits = jnp.einsum("bgh,gkh->bgk", q, mem, precision=hp) / jnp.sqrt(jnp.float32(Hc))
    attn = jax.nn.softmax(logits, axis=-1)
    h = jnp.einsum("bgk,gkh->bgh", attn, mem, precision=hp).reshape(bsz, G * Hc)

    # GroupWiseResnetBlockConv1d chain (eval-mode BN)
    for p in raw["blocks"]:
        s0 = p["bn0_gamma"] / jnp.sqrt(p["bn0_var"] + BN_EPS)
        a0 = p["bn0_beta"] - p["bn0_mean"] * s0
        s1 = p["bn1_gamma"] / jnp.sqrt(p["bn1_var"] + BN_EPS)
        a1 = p["bn1_beta"] - p["bn1_mean"] * s1
        net = _grouped_mm(jnp.maximum(h * s0 + a0, 0.0), p["w0"]) + p["b0"]
        dx = _grouped_mm(jnp.maximum(net * s1 + a1, 0.0), p["w1"]) + p["b1"]
        h = _grouped_mm(h, p["ws"]) + dx

    # self.act appended in the layer list, then self.act applied again in forward
    ya = _leaky(_leaky(h))
    out = _grouped_mm(ya, raw["wout"]) + raw["bout"]
    return out.reshape(bsz, G, Od)


if __name__ == "__main__":
    key = jax.random.PRNGKey(0)
    kp, kx = jax.random.split(key)
    raw = init_raw_params(kp)
    wslab, vslab, dims = pack_params(raw)
    x = jax.random.normal(kx, (B, CONST_LATENT_DIM), jnp.float32)   # [B, const_latent_dim]

    out = attention_encoder_forward(wslab, vslab, dims, x)
    jax.block_until_ready(out)
    assert out.shape == (B, SPEC["groups"], SPEC["out_dim"])

    ref = reference_forward(raw, x)
    max_err = float(jnp.max(jnp.abs(out - ref)))
    assert jnp.allclose(out, ref, atol=1e-2, rtol=1e-2), max_err
    print("KERNEL_OK")
</pallas_src>

<mosaic_0001>
module attributes {stable_mosaic.version = 11 : i64} {
  func.func @_attention_encoder_kernel(%arg0: memref<8x32xf32, #tpu.memory_space<vmem>>, %arg1: memref<160x128xbf16, #tpu.memory_space<vmem>>, %arg2: memref<8x128xf32, #tpu.memory_space<vmem>>, %arg3: memref<8x128xf32, #tpu.memory_space<vmem>>) attributes {dimension_semantics = [], scalar_prefetch = 0 : i64, scratch_operands = 0 : i64, tpu.core_type = #tpu.core_type<tc>} {
    %c0 = arith.constant 0 : index
    %c0_0 = arith.constant 0 : index
    %0 = vector.load %arg0[%c0, %c0_0] : memref<8x32xf32, #tpu.memory_space<vmem>>, vector<8x32xf32>
    %c0_1 = arith.constant 0 : index
    %c0_2 = arith.constant 0 : index
    %1 = vector.load %arg1[%c0_1, %c0_2] : memref<160x128xbf16, #tpu.memory_space<vmem>>, vector<32x64xbf16>
    %c32 = arith.constant 32 : index
    %c0_3 = arith.constant 0 : index
    %2 = vector.load %arg1[%c32, %c0_3] : memref<160x128xbf16, #tpu.memory_space<vmem>>, vector<64x96xbf16>
    %c96 = arith.constant 96 : index
    %c0_4 = arith.constant 0 : index
    %3 = vector.load %arg1[%c96, %c0_4] : memref<160x128xbf16, #tpu.memory_space<vmem>>, vector<32x16xbf16>
    %c128 = arith.constant 128 : index
    %c0_5 = arith.constant 0 : index
    %4 = vector.load %arg1[%c128, %c0_5] : memref<160x128xbf16, #tpu.memory_space<vmem>>, vector<16x16xbf16>
    %c144 = arith.constant 144 : index
    %c0_6 = arith.constant 0 : index
    %5 = vector.load %arg1[%c144, %c0_6] : memref<160x128xbf16, #tpu.memory_space<vmem>>, vector<16x128xbf16>
    %c0_7 = arith.constant 0 : index
    %c0_8 = arith.constant 0 : index
    %6 = vector.load %arg2[%c0_7, %c0_8] : memref<8x128xf32, #tpu.memory_space<vmem>>, vector<1x64xf32>
    %c1 = arith.constant 1 : index
    %c0_9 = arith.constant 0 : index
    %7 = vector.load %arg2[%c1, %c0_9] : memref<8x128xf32, #tpu.memory_space<vmem>>, vector<1x32xf32>
    %c2 = arith.constant 2 : index
    %c0_10 = arith.constant 0 : index
    %8 = vector.load %arg2[%c2, %c0_10] : memref<8x128xf32, #tpu.memory_space<vmem>>, vector<1x16xf32>
    %c3 = arith.constant 3 : index
    %c0_11 = arith.constant 0 : index
    %9 = vector.load %arg2[%c3, %c0_11] : memref<8x128xf32, #tpu.memory_space<vmem>>, vector<1x16xf32>
    %c4 = arith.constant 4 : index
    %c0_12 = arith.constant 0 : index
    %10 = vector.load %arg2[%c4, %c0_12] : memref<8x128xf32, #tpu.memory_space<vmem>>, vector<1x16xf32>
    %c5 = arith.constant 5 : index
    %c0_13 = arith.constant 0 : index
    %11 = vector.load %arg2[%c5, %c0_13] : memref<8x128xf32, #tpu.memory_space<vmem>>, vector<1x128xf32>
    %12 = arith.truncf %0 : vector<8x32xf32> to vector<8x32xbf16>
    %cst = arith.constant dense<0.000000e+00> : vector<8x64xf32>
    %13 = tpu.matmul %12, %1, %cst {dimension_numbers = #tpu.dot_dimension_numbers<[1], [0], [0], [1], [0, 0, 1, 1], [], []>} : vector<8x32xbf16>, vector<32x64xbf16>, vector<8x64xf32> -> vector<8x64xf32>
    %14 = vector.broadcast %6 : vector<1x64xf32> to vector<8x64xf32>
    %15 = arith.addf %13, %14 : vector<8x64xf32>
    %cst_14 = arith.constant dense<0xFF800000> : vector<8xf32>
    %16 = vector.multi_reduction <maximumf>, %15, %cst_14 [1] : vector<8x64xf32> to vector<8xf32>
    %17 = vector.shape_cast %16 : vector<8xf32> to vector<8x1xf32>
    %18 = vector.broadcast %17 : vector<8x1xf32> to vector<8x64xf32>
    %19 = arith.subf %15, %18 : vector<8x64xf32>
    %20 = math.exp %19 : vector<8x64xf32>
    %21 = arith.truncf %20 : vector<8x64xf32> to vector<8x64xbf16>
    %cst_15 = arith.constant dense<0.000000e+00> : vector<8x96xf32>
    %22 = tpu.matmul %21, %2, %cst_15 {dimension_numbers = #tpu.dot_dimension_numbers<[1], [0], [0], [1], [0, 0, 1, 1], [], []>} : vector<8x64xbf16>, vector<64x96xbf16>, vector<8x96xf32> -> vector<8x96xf32>
    %23 = vector.extract_strided_slice %22 {offsets = [0, 0], sizes = [8, 48], strides = [1, 1]} : vector<8x96xf32> to vector<8x48xf32>
    %24 = vector.extract_strided_slice %22 {offsets = [0, 48], sizes = [8, 48], strides = [1, 1]} : vector<8x96xf32> to vector<8x48xf32>
    %cst_16 = arith.constant 1.000000e-30 : f32
    %25 = vector.broadcast %cst_16 : f32 to vector<8x48xf32>
    %26 = arith.maximumf %24, %25 : vector<8x48xf32>
    %27 = tpu.reciprocal %26 {approx = true} : vector<8x48xf32> -> vector<8x48xf32>
    %28 = arith.mulf %23, %27 : vector<8x48xf32>
    %29 = vector.extract_strided_slice %28 {offsets = [0, 0], sizes = [8, 32], strides = [1, 1]} : vector<8x48xf32> to vector<8x32xf32>
    %30 = vector.extract_strided_slice %28 {offsets = [0, 32], sizes = [8, 16], strides = [1, 1]} : vector<8x48xf32> to vector<8x16xf32>
    %31 = vector.broadcast %7 : vector<1x32xf32> to vector<8x32xf32>
    %32 = arith.addf %29, %31 : vector<8x32xf32>
    %cst_17 = arith.constant 0.000000e+00 : f32
    %33 = vector.broadcast %cst_17 : f32 to vector<8x32xf32>
    %34 = arith.maximumf %32, %33 : vector<8x32xf32>
    %35 = arith.truncf %34 : vector<8x32xf32> to vector<8x32xbf16>
    %cst_18 = arith.constant dense<0.000000e+00> : vector<8x16xf32>
    %36 = tpu.matmul %35, %3, %cst_18 {dimension_numbers = #tpu.dot_dimension_numbers<[1], [0], [0], [1], [0, 0, 1, 1], [], []>} : vector<8x32xbf16>, vector<32x16xbf16>, vector<8x16xf32> -> vector<8x16xf32>
    %37 = vector.broadcast %8 : vector<1x16xf32> to vector<8x16xf32>
    %38 = arith.mulf %36, %37 : vector<8x16xf32>
    %39 = vector.broadcast %9 : vector<1x16xf32> to vector<8x16xf32>
    %40 = arith.addf %38, %39 : vector<8x16xf32>
    %cst_19 = arith.constant 0.000000e+00 : f32
    %41 = vector.broadcast %cst_19 : f32 to vector<8x16xf32>
    %42 = arith.maximumf %40, %41 : vector<8x16xf32>
    %43 = arith.truncf %42 : vector<8x16xf32> to vector<8x16xbf16>
    %cst_20 = arith.constant dense<0.000000e+00> : vector<8x16xf32>
    %44 = tpu.matmul %43, %4, %cst_20 {dimension_numbers = #tpu.dot_dimension_numbers<[1], [0], [0], [1], [0, 0, 1, 1], [], []>} : vector<8x16xbf16>, vector<16x16xbf16>, vector<8x16xf32> -> vector<8x16xf32>
    %45 = vector.broadcast %10 : vector<1x16xf32> to vector<8x16xf32>
    %46 = arith.addf %44, %45 : vector<8x16xf32>
    %47 = arith.addf %30, %46 : vector<8x16xf32>
    %cst_21 = arith.constant 0.000000e+00 : f32
    %48 = vector.broadcast %cst_21 : f32 to vector<8x16xf32>
    %49 = arith.cmpf oge, %47, %48 : vector<8x16xf32>
    %cst_22 = arith.constant 4.000000e-02 : f32
    %50 = vector.broadcast %cst_22 : f32 to vector<8x16xf32>
    %51 = arith.mulf %50, %47 : vector<8x16xf32>
    %52 = arith.select %49, %47, %51 : vector<8x16xi1>, vector<8x16xf32>
    %53 = arith.truncf %52 : vector<8x16xf32> to vector<8x16xbf16>
    %cst_23 = arith.constant dense<0.000000e+00> : vector<8x128xf32>
    %54 = tpu.matmul %53, %5, %cst_23 {dimension_numbers = #tpu.dot_dimension_numbers<[1], [0], [0], [1], [0, 0, 1, 1], [], []>} : vector<8x16xbf16>, vector<16x128xbf16>, vector<8x128xf32> -> vector<8x128xf32>
    %55 = vector.broadcast %11 : vector<1x128xf32> to vector<8x128xf32>
    %56 = arith.addf %54, %55 : vector<8x128xf32>
    %c0_24 = arith.constant 0 : index
    %c0_25 = arith.constant 0 : index
    %57 = vector.load %arg3[%c0_24, %c0_25] : memref<8x128xf32, #tpu.memory_space<vmem>>, vector<8x128xf32>
    tpu.vector_store %arg3[%c0_24, %c0_25], %56 {strides = array<i32>} : memref<8x128xf32, #tpu.memory_space<vmem>>, vector<8x128xf32>,
    return
  }
}

</mosaic_0001>

<bundles_post_ra>
// kernel: tpu_custom_call.1
= control target key start
LH: loop header
LB: loop body
LE: loop exit
PB: predicated region body
PF: predicated region fallthrough
CT: control target
= control target key end

     0   :  { %8 = vsyncpa [#allocation3], 0  ;;  %s689_s0 = inlined_call_operand.hbm [shape: f32[8,32], index: 0, kind: input, shape index: {}]   ;;  %s690_s1 = inlined_call_operand.hbm [shape: bf16[160,128], index: 1, kind: input, shape index: {}]   ;;  %s691_s2 = inlined_call_operand.hbm [shape: f32[8,128], index: 2, kind: input, shape index: {}]   ;;  %s692_s3 = inlined_call_operand.hbm [shape: f32[8,128], index: 3, kind: output, shape index: {}]  }
   0x1   :  { %9 = vsyncpa [#allocation6], 0 }
   0x2   :  { %10 = vsyncpa [#allocation4], 0  ;;  %s620_s12 = smov [#allocation5]  }
   0x3   :  { %s26_s13 = sshll.u32 %s620_s12, 4  ;;  %s27_s13 = int_to_ptr.vmem [resolvable:$true] %s26_s13 }
   0x4   :  { %s542_s14 = scalar_lea.vmem %s27_s13, 1280  ;;  %p547_p1 = scmp.lt.s32.totalorder %s27_s13, %s27_s13 }
   0x5   :  { %p543_p0 = scmp.ne.s32.totalorder %s27_s13, %s542_s14  ;;  %p548_p2 = scmp.lt.s32.totalorder %s542_s14, %s542_s14 }
   0x7   :  { %p549_p3 = por %p548_p2, %p547_p1 }
   0x9   :  { %p550_p4 = pnand %p549_p3, %p543_p0 }
   0xb   :  { %553 = shalt.err (!%p550_p4)
}
   0xc   :  { %s621_s15 = smov 64   ;;  %s622_s16 = smov 4  }
   0xd   :  { %32 = dma.hbm_to_vmem [thread:$0]  %s690_s1, 1280, %s27_s13, [#allocation6], %s621_s15, %s621_s15, %s622_s16  }
   0xe   :  { %s623_s19 = smov [#allocation2]   ;;  %s624_s21 = smov [#allocation7]  }
   0xf   :  { %s17_s20 = sshll.u32 %s623_s19, 4  ;;  %s39_s22 = sshll.u32 %s624_s21, 4  ;;  %s18_s20 = int_to_ptr.vmem [resolvable:$true] %s17_s20  ;;  %s40_s22 = int_to_ptr.vmem [resolvable:$true] %s39_s22 }
  0x10   :  { %s562_s23 = scalar_lea.vmem %s18_s20, 128  ;;  %p567_p6 = scmp.lt.s32.totalorder %s18_s20, %s18_s20 }
  0x11   :  { %p563_p5 = scmp.ne.s32.totalorder %s18_s20, %s562_s23  ;;  %p568_p7 = scmp.lt.s32.totalorder %s562_s23, %s562_s23 }
  0x13   :  { %p569_p8 = por %p568_p7, %p567_p6 }
  0x15   :  { %p570_p9 = pnand %p569_p8, %p563_p5 }
  0x17   :  { %573 = shalt.err (!%p570_p9)
}
  0x18   :  { %20 = dma.hbm_to_vmem [thread:$0]  %s689_s0, 128, %s18_s20, [#allocation3]  }
  0x19   :  { %s582_s26 = scalar_lea.vmem %s40_s22, 128  ;;  %p587_p11 = scmp.lt.s32.totalorder %s40_s22, %s40_s22 }
  0x1a   :  { %p583_p10 = scmp.ne.s32.totalorder %s40_s22, %s582_s26  ;;  %p588_p12 = scmp.lt.s32.totalorder %s582_s26, %s582_s26 }
  0x1c   :  { %p589_p13 = por %p588_p12, %p587_p11 }
  0x1e   :  { %p590_p0 = pnand %p589_p13, %p583_p10 }
  0x20   :  { %593 = shalt.err (!%p590_p0)
}
  0x21   :  { %42 = dma.hbm_to_vmem [thread:$0]  %s691_s2, 128, %s40_s22, [#allocation6]  }
  0x22   :  { %614 = dma.done.wait [#allocation3], 128  }
  0x23   :  { %615 = vsyncadd [#allocation3], 4294967168 }
  0x24   :  { %616 = dma.done.wait [#allocation6], 1408  }
  0x25   :  { %617 = vsyncadd [#allocation6], 4294965888  ;;  %v625_v0 = vmov 0.0   ;;  %vm626_vm0 = vmmov 0   ;;  %v520_v1 = vld [vmem:[#allocation5 + $0x8] sm:$0xff]   ;;  %v521_v2 = vld [vmem:[#allocation5] sm:$0xff]  }
  0x26   :  { %469 = vmatprep.subr.bf16.mxu0 %v625_v0  ;;  %473 = vmatprep.mubr.msk.bf16.mxu0 %vm626_vm0, %v625_v0  ;;  %v53_v3 = vld [vmem:[#allocation2] sm:$0xff]  ;;  %vm97_vm1 = vcmask 261120   ;;  %v433_v5 = vld [vmem:[#allocation7] ss:$0 sm:$0xff]  ;;  %vm141_vm2 = vcmask 523264   ;;  %v522_v12 = vld [vmem:[#allocation5 + $0x28] sm:$0xff]  }
  0x27   :  { %477 = vmatprep.subr.bf16.mxu1 %v625_v0  ;;  %485 = vmatprep.mubr.msk.bf16.mxu1 %vm626_vm0, %v625_v0  ;;  %v80_v4 = vpack.c.bf16 %v53_v3, %v53_v3  ;;  %v523_v13 = vld [vmem:[#allocation5 + $0x20] sm:$0xff]   ;;  %v524_v14 = vld [vmem:[#allocation5 + $0x18] sm:$0xff]   ;;  %v525_v15 = vld [vmem:[#allocation5 + $0x10] sm:$0xff]   ;;  %s627_s0 = smov 80   ;;  %vm307_vm3 = vcmask 130048   ;;  %s628_s2 = smov 32  }
  0x28   :  { %470 = vmatpush3.bf16.msra.mxu0 %v520_v1  ;;  %478 = vmatpush3.bf16.msra.mxu1 %v522_v12  ;;  %v526_v24 = vld [vmem:[#allocation5 + $0x38] sm:$0xff]   ;;  %v527_v27 = vld [vmem:[#allocation5 + $0x30] sm:$0xff]   ;;  %v528_v35 = vld [vmem:[#allocation5 + $0x40] sm:$0xff]   ;;  %s629_s28 = smov 96   ;;  %s630_s29 = smov [#allocation8]  }
  0x29   :  { %471 = vmatprep.subr.bf16.mxu0 %v625_v0  ;;  %479 = vmatprep.subr.bf16.mxu1 %v625_v0  ;;  %v442_v29 = vld [vmem:[#allocation7 + $0x1] ss:$0 sm:$0xff]  ;;  %v446_v36 = vld [vmem:[#allocation7 + $0x2] ss:$0 sm:$0xff]  ;;  %v447_v37 = vld [vmem:[#allocation7 + $0x3] ss:$0 sm:$0xff] }
  0x2a   :  { %v529_v46 = vld [vmem:[#allocation5 + $0x48] sm:$0xff]   ;;  %v448_v47 = vld [vmem:[#allocation7 + $0x4] ss:$0 sm:$0xff]  ;;  %v451_v59 = vld [vmem:[#allocation7 + $0x5] ss:$0 sm:$0xff]  ;;  %s423_s30 = sshll.u32 %s630_s29, 4  ;;  %s424_s30 = int_to_ptr.vmem [resolvable:$true] %s423_s30 }
  0x2b   :  { %s594_s4 = scalar_lea.vmem %s424_s30, 128  ;;  %p599_p2 = scmp.lt.s32.totalorder %s424_s30, %s424_s30 }
  0x2c   :  { %472 = vmatpush3.bf16.msra.mxu0 %v521_v2  ;;  %480 = vmatpush3.bf16.msra.mxu1 %v523_v13  ;;  %p595_p1 = scmp.ne.s32.totalorder %s424_s30, %s594_s4  ;;  %p600_p3 = scmp.lt.s32.totalorder %s594_s4, %s594_s4 }
  0x2d   :  { %489 = vmatprep.subr.bf16.mxu0 %v625_v0  ;;  %481 = vmatprep.subr.bf16.mxu1 %v625_v0 }
  0x2e   :  { %p601_p4 = por %p600_p3, %p599_p2 }
  0x2f   :  { %474 = vmatmul.mubr.msk.bf16.vlgmr.msra.gmra.mxu0 %vm97_vm1, %v80_v4 }
  0x30   :  { %493 = vmatprep.mubr.msk.bf16.mxu0 %vm626_vm0, %v625_v0  ;;  %482 = vmatpush3.bf16.msra.mxu1 %v524_v14  ;;  %p602_p5 = pnand %p601_p4, %p595_p1 }
  0x31   :  { %483 = vmatprep.subr.bf16.mxu1 %v625_v0  ;;  %490 = vmatpush3.bf16.msra.mxu0 %v526_v24 }
  0x32   :  { %491 = vmatprep.subr.bf16.mxu0 %v625_v0 }
  0x34   :  { %484 = vmatpush3.bf16.msra.mxu1 %v525_v15 }
  0x35   :  { %503 = vmatprep.subr.bf16.mxu1 %v625_v0  ;;  %492 = vmatpush3.bf16.msra.mxu0 %v527_v27 }
  0x36   :  { %497 = vmatprep.subr.bf16.mxu0 %v625_v0 }
  0xef   :  { %v135_v6 = vpop.f32.mrf.mxu0 }
  0xf0   :  { %v136_v7 = vadd.f32 %v433_v5, %v135_v6 }
  0xf1   :  { %v475_v8 = vpop.f32.mrf.mxu0 }
  0xf2   :  { %v142_v9 = vsel %vm141_vm2, %v136_v7, -inf }
  0xf3   :  { %143 = vmax.xlane.f32.xlu0 %v142_v9  ;;  %v138_v10 = vpop.f32.mrf.mxu0 }
  0xf5   :  { %v476_v11 = vpop.f32.mrf.mxu0 }
 0x17c   :  { %v144_v16 = vpop.xlane.xlu0 %143 }
 0x17d   :  { %v145_v17 = vsub.f32 %v136_v7, %v144_v16 }
 0x17f   :  { %v146_v18 = vmul.f32 1.442695, %v145_v17 }
 0x181   :  { %530 = vpow2.f32 %v146_v18 }
 0x18e   :  { %v531_v19 = vpop.eup %530 }
 0x18f   :  { %v148_v20 = vpack.c.bf16 %v531_v19, %v531_v19 }
 0x191   :  { %486 = vmatmul.mubr.msk.bf16.vlgmr.msra.gmra.mxu1 %vm141_vm2, %v148_v20 }
 0x192   :  { %505 = vmatprep.mubr.msk.bf16.mxu1 %vm626_vm0, %v625_v0  ;;  %504 = vmatpush3.bf16.msra.mxu1 %v529_v46 }
 0x251   :  { %v210_v21 = vpop.f32.mrf.mxu1 }
 0x252   :  { %v216_v22 = vmax.f32 %v210_v21, 1e-30 }
 0x253   :  { %v487_v23 = vpop.f32.mrf.mxu1 }
 0x254   :  { %532 = vrcp.f32 %v216_v22 }
 0x255   :  { %v213_v25 = vpop.f32.mrf.mxu1 }
 0x257   :  { %v488_v26 = vpop.f32.mrf.mxu1 }
 0x261   :  { %v533_v28 = vpop.eup %532 }
 0x262   :  { %219 = vrot.lane.b32.xlu0 %v533_v28, %s627_s0 }
 0x2d4   :  { %v220_v30 = vpop.permute.xlu0 %219 }
 0x2d5   :  { %v222_v31 = vmul.f32 %v220_v30, %v210_v21 }
 0x2d7   :  { %v227_v32 = vadd.f32 %v442_v29, %v222_v31 }
 0x2d9   :  { %v228_v33 = vmax.f32 %v227_v32, 0.0 }
 0x2db   :  { %v229_v34 = vpack.c.bf16 %v228_v33, %v228_v33 }
 0x2dd   :  { %494 = vmatmul.mubr.msk.bf16.vlgmr.msra.gmra.mxu0 %vm97_vm1, %v229_v34 }
 0x2de   :  { %499 = vmatprep.mubr.msk.bf16.mxu0 %vm626_vm0, %v625_v0  ;;  %498 = vmatpush3.bf16.msra.mxu0 %v528_v35 }
 0x39d   :  { %v279_v38 = vpop.f32.mrf.mxu0 }
 0x39e   :  { %v289_v39 = vmul.f32 %v446_v36, %v279_v38 }
 0x39f   :  { %v495_v40 = vpop.f32.mrf.mxu0 }
 0x3a0   :  { %v294_v41 = vadd.f32 %v447_v37, %v289_v39 }
 0x3a1   :  { %v282_v42 = vpop.f32.mrf.mxu0 }
 0x3a2   :  { %v295_v43 = vmax.f32 %v294_v41, 0.0 }
 0x3a3   :  { %v496_v44 = vpop.f32.mrf.mxu0 }
 0x3a4   :  { %v296_v45 = vpack.c.bf16 %v295_v43, %v295_v43 }
 0x3a6   :  { %500 = vmatmul.mubr.msk.bf16.vlgmr.msra.gmra.mxu0 %vm307_vm3, %v296_v45 }
 0x466   :  { %v345_v48 = vpop.f32.mrf.mxu0 }
 0x467   :  { %v346_v49 = vadd.f32 %v448_v47, %v345_v48 }
 0x468   :  { %v501_v50 = vpop.f32.mrf.mxu0 }
 0x469   :  { %352 = vrot.lane.b32.xlu1 %v346_v49, %s628_s2 }
 0x46a   :  { %v348_v51 = vpop.f32.mrf.mxu0 }
 0x46c   :  { %v502_v52 = vpop.f32.mrf.mxu0 }
 0x4db   :  { %v353_v53 = vpop.permute.xlu1 %352 }
 0x4dc   :  { %v355_v54 = vadd.f32 %v353_v53, %v222_v31 }
 0x4de   :  { %vm356_vm4 = vcmp.ge.f32.partialorder %v355_v54, 0.0  ;;  %v357_v55 = vmul.f32 0.04, %v355_v54 }
 0x4e0   :  { %v358_v56 = vsel %vm356_vm4, %v355_v54, %v357_v55 }
 0x4e1   :  { %v359_v57 = vpack.c.bf16 %v358_v56, %v358_v56 }
 0x4e3   :  { %365 = vrot.lane.b32.xlu1 %v359_v57, %s629_s28 }
 0x555   :  { %v366_v58 = vpop.permute.xlu1 %365 }
 0x556   :  { %506 = vmatmul.mubr.msk.bf16.vlgmr.msra.gmra.mxu1 %vm307_vm3, %v366_v58 }
 0x616   :  { %v410_v60 = vpop.f32.mrf.mxu1 }
 0x617   :  { %v411_v61 = vadd.f32 %v451_v59, %v410_v60 }
 0x618   :  { %v507_v62 = vpop.f32.mrf.mxu1 }
 0x619   :  { %416 = vst [vmem:[#allocation8] sm:$0xff] %v411_v61 }
 0x61a   :  { %v413_v63 = vpop.f32.mrf.mxu1 }
 0x61b   :  { %605 = shalt.err (!%p602_p5)
}
 0x61c   :  { %426 = dma.vmem_to_hbm [thread:$0]  %s424_s30, 128, %s692_s3, [#allocation4]   ;;  %v508_v0 = vpop.f32.mrf.mxu1 }
 0x61d   :  { %618 = dma.done.wait [#allocation4], 128  }
 0x61e   :  { %619 = vsyncadd [#allocation4], 4294967168 }
 0x61f   :  { %430 = vsyncpa [#allocation3], 1 }
 0x620   :  { %431 = vsyncpa [#allocation6], 1 }
 0x621   :  { %432 = vsyncpa [#allocation4], 1 }

</bundles_post_ra>
